<compile_context>
chip_gen: v5e
topology: v5e:2x2
jax: 0.10.0
libtpu: 0.0.40
codegen_flags: <defaults>
</compile_context>

<pallas_src>
import jax
import jax.numpy as jnp
from jax.experimental import pallas as pl
from jax.experimental.pallas import tpu as pltpu

LANE = 128   # lane width (last-dim tile)
SUB = 8      # sublane width (second-to-last-dim tile)


# --------------------------------------------------------------------------
# Kernel: zero-pad last-timestep rows, then 4 fused matmuls
# (actor + critic packed along the output/feature dims).
#   x_ref  : (B, Z)         last timestep (selected by BlockSpec index_map)
#   w_ref  : (4, 128, 128)  fused + padded bf16 weights [W1 | W2 | head1 | head2]
#   o_ref  : (Bp, 128)      fused f32 output: [:, :n_act]=logits, [:, n_act]=value
#   xp_ref : (Bp, 128)      f32 VMEM scratch for the tile-aligned padded input
# --------------------------------------------------------------------------
def _net_kernel(x_ref, w_ref, o_ref, xp_ref):
    B, Z = x_ref.shape
    # Zero-pad into a tile-aligned slab (one vreg of zeros + one small masked store).
    xp_ref[...] = jnp.zeros_like(xp_ref)
    xp_ref[0:B, 0:Z] = x_ref[...]

    h = xp_ref[...]                                               # (Bp, 128) f32
    h = jnp.tanh(jnp.dot(h.astype(jnp.bfloat16), w_ref[0],
                         preferred_element_type=jnp.float32))
    h = jnp.tanh(jnp.dot(h.astype(jnp.bfloat16), w_ref[1],
                         preferred_element_type=jnp.float32))
    h = jnp.maximum(jnp.dot(h.astype(jnp.bfloat16), w_ref[2],
                            preferred_element_type=jnp.float32), 0.0)
    o_ref[...] = jnp.dot(h.astype(jnp.bfloat16), w_ref[3],
                         preferred_element_type=jnp.float32)


def net_forward(x, w_slab, action_total):
    """x: (T, B, zdim) f32.  Returns (logits (B, action_total), value (B, 1))."""
    T, B, Z = x.shape
    Bp = max(SUB, ((B + SUB - 1) // SUB) * SUB)

    out = pl.pallas_call(
        _net_kernel,
        out_shape=jax.ShapeDtypeStruct((Bp, LANE), jnp.float32),
        grid=(1,),
        in_specs=[
            # Select the last timestep directly from HBM: block (1, B, Z) at (T-1, 0, 0),
            # leading dim squeezed so the kernel sees (B, Z).
            pl.BlockSpec((pl.Squeezed(), B, Z), lambda i: (T - 1, 0, 0)),
            # Full weight slab, resident in VMEM.
            pl.BlockSpec((4, LANE, LANE), lambda i: (0, 0, 0)),
        ],
        out_specs=pl.BlockSpec((Bp, LANE), lambda i: (0, 0)),
        scratch_shapes=[pltpu.VMEM((Bp, LANE), jnp.float32)],
        compiler_params=pltpu.CompilerParams(dimension_semantics=("arbitrary",)),
    )(x, w_slab)

    logits = out[:B, :action_total]
    value = out[:B, action_total:action_total + 1]
    return logits, value


# --------------------------------------------------------------------------
# Parameter construction (plain-JAX glue): orthogonal weights / zero biases as
# in the torch init, then actor+critic fusion + 128-lane padding + bf16 cast.
# --------------------------------------------------------------------------
def make_params(key, zdim, action_shape):
    half = zdim // 2
    quarter = half // 2
    n_act = int(sum(action_shape))

    # All fused feature dims must fit in one 128-lane tile (silent-truncation guard).
    assert zdim <= LANE, f"zdim={zdim} > {LANE} not supported by this fused kernel"
    assert 2 * half <= LANE and 2 * quarter <= LANE
    assert n_act + 1 <= LANE, f"sum(action_shape)+1={n_act + 1} > {LANE}"

    ortho = jax.nn.initializers.orthogonal()
    # PyTorch Linear weight is (out, in); transpose to (in, out) for x @ W.
    shapes = [
        (half, zdim), (half, half),          # actor shared (2 layers)
        (half, zdim), (half, half),          # critic shared
        (quarter, half), (n_act, quarter),   # actor head
        (quarter, half), (1, quarter),       # critic head
    ]
    keys = jax.random.split(key, len(shapes))
    Ws = [ortho(k, s, jnp.float32).T for k, s in zip(keys, shapes)]
    asw1, asw2, csw1, csw2, ahw1, ahw2, chw1, chw2 = Ws
    raw = (asw1, asw2, csw1, csw2, ahw1, ahw2, chw1, chw2)   # f32, for the reference

    def pad128(w):
        out = jnp.zeros((LANE, LANE), jnp.float32)
        return out.at[: w.shape[0], : w.shape[1]].set(w)

    def blockdiag(a, c):
        m = jnp.zeros((a.shape[0] + c.shape[0], a.shape[1] + c.shape[1]), jnp.float32)
        m = m.at[: a.shape[0], : a.shape[1]].set(a)
        m = m.at[a.shape[0]:, a.shape[1]:].set(c)
        return m

    w1 = jnp.concatenate([asw1, csw1], axis=1)   # (zdim, 2*half)
    w2 = blockdiag(asw2, csw2)                   # (2*half, 2*half)
    w3 = blockdiag(ahw1, chw1)                   # (2*half, 2*quarter)
    w4 = blockdiag(ahw2, chw2)                   # (2*quarter, n_act + 1)

    # bf16 weight slab: halves the dominant DMA; matmuls accumulate in f32.
    # TODO(synk): biases are exactly zero at init (nn.init.constant_(bias, 0));
    # if trained non-zero biases must be supported, reinstate a bias slab.
    w_slab = jnp.stack([pad128(w1), pad128(w2), pad128(w3), pad128(w4)],
                       axis=0).astype(jnp.bfloat16)
    return w_slab, raw


def reference_forward(x, raw):
    """Pure-JAX f32 reference mirroring the PyTorch module exactly (biases = 0)."""
    asw1, asw2, csw1, csw2, ahw1, ahw2, chw1, chw2 = raw
    ha = jnp.tanh(x @ asw1)
    ha = jnp.tanh(ha @ asw2)
    logits = jnp.maximum(ha[-1] @ ahw1, 0.0) @ ahw2

    hc = jnp.tanh(x @ csw1)
    hc = jnp.tanh(hc @ csw2)
    value = jnp.maximum(hc[-1] @ chw1, 0.0) @ chw2
    return logits, value


if __name__ == "__main__":
    # Small shapes implied by the module: 3-D input (T, B, zdim).
    T, B, zdim = 8, 2, 32
    action_shape = (3, 4)
    n_act = int(sum(action_shape))

    key = jax.random.PRNGKey(0)
    k_x, k_p = jax.random.split(key)
    x = jax.random.normal(k_x, (T, B, zdim), dtype=jnp.float32)
    w_slab, raw_params = make_params(k_p, zdim, action_shape)

    fwd = jax.jit(lambda xx, ww: net_forward(xx, ww, n_act))
    logits, value = fwd(x, w_slab)
    jax.block_until_ready((logits, value))

    ref_logits, ref_value = reference_forward(x, raw_params)
    assert logits.shape == (B, n_act) and value.shape == (B, 1)
    # bf16 weights -> ~1e-3 relative error vs the f32 reference; tolerance relaxed.
    assert jnp.allclose(logits, ref_logits, atol=3e-2, rtol=3e-2)
    assert jnp.allclose(value, ref_value, atol=3e-2, rtol=3e-2)

    # TODO(synk): MultiCategorical sample/log_prob/entropy are distribution
    # utilities applied to the returned logits, not part of the forward hot path.
    print("KERNEL_OK")
</pallas_src>

<mosaic_0001>
module attributes {stable_mosaic.version = 11 : i64} {
  func.func @_net_kernel(%arg0: i32, %arg1: memref<1x2x32xf32, #tpu.memory_space<vmem>>, %arg2: memref<4x128x128xbf16, #tpu.memory_space<vmem>>, %arg3: memref<8x128xf32, #tpu.memory_space<vmem>>, %arg4: memref<8x128xf32, #tpu.memory_space<vmem>>) attributes {dimension_semantics = [#tpu.dimension_semantics<arbitrary>], iteration_bounds = array<i64: 1>, scalar_prefetch = 0 : i64, scratch_operands = 1 : i64, tpu.core_type = #tpu.core_type<tc>, window_params = [{transform_indices = @transform_0, window_bounds = array<i64: 1, 2, 32>}, {pipeline_mode = #tpu.pipeline_mode<synchronous>, transform_indices = @transform_1, window_bounds = array<i64: 4, 128, 128>}, {pipeline_mode = #tpu.pipeline_mode<synchronous>, transform_indices = @transform_2, window_bounds = array<i64: 8, 128>}]} {
    %cst = arith.constant 0.000000e+00 : f32
    %0 = vector.broadcast %cst : f32 to vector<8x128xf32>
    %c0 = arith.constant 0 : index
    %c0_0 = arith.constant 0 : index
    %1 = vector.load %arg4[%c0, %c0_0] : memref<8x128xf32, #tpu.memory_space<vmem>>, vector<8x128xf32>
    tpu.vector_store %arg4[%c0, %c0_0], %0 {strides = array<i32>} : memref<8x128xf32, #tpu.memory_space<vmem>>, vector<8x128xf32>,
    %c0_1 = arith.constant 0 : index
    %c0_2 = arith.constant 0 : index
    %c0_3 = arith.constant 0 : index
    %2 = vector.load %arg1[%c0_1, %c0_2, %c0_3] : memref<1x2x32xf32, #tpu.memory_space<vmem>>, vector<1x2x32xf32>
    %3 = vector.shape_cast %2 : vector<1x2x32xf32> to vector<2x32xf32>
    %c0_4 = arith.constant 0 : index
    %c0_5 = arith.constant 0 : index
    %4 = vector.load %arg4[%c0_4, %c0_5] : memref<8x128xf32, #tpu.memory_space<vmem>>, vector<2x32xf32>
    tpu.vector_store %arg4[%c0_4, %c0_5], %3 {strides = array<i32>} : memref<8x128xf32, #tpu.memory_space<vmem>>, vector<2x32xf32>,
    %c0_6 = arith.constant 0 : index
    %c0_7 = arith.constant 0 : index
    %5 = vector.load %arg4[%c0_6, %c0_7] : memref<8x128xf32, #tpu.memory_space<vmem>>, vector<8x128xf32>
    %6 = arith.truncf %5 : vector<8x128xf32> to vector<8x128xbf16>
    %c0_8 = arith.constant 0 : index
    %c0_9 = arith.constant 0 : index
    %c0_10 = arith.constant 0 : index
    %7 = vector.load %arg2[%c0_8, %c0_9, %c0_10] : memref<4x128x128xbf16, #tpu.memory_space<vmem>>, vector<1x128x128xbf16>
    %8 = vector.shape_cast %7 : vector<1x128x128xbf16> to vector<128x128xbf16>
    %cst_11 = arith.constant dense<0.000000e+00> : vector<8x128xf32>
    %9 = tpu.matmul %6, %8, %cst_11 {dimension_numbers = #tpu.dot_dimension_numbers<[1], [0], [0], [1], [0, 0, 1, 1], [], []>} : vector<8x128xbf16>, vector<128x128xbf16>, vector<8x128xf32> -> vector<8x128xf32>
    %10 = math.tanh %9 : vector<8x128xf32>
    %11 = arith.truncf %10 : vector<8x128xf32> to vector<8x128xbf16>
    %c1 = arith.constant 1 : index
    %c0_12 = arith.constant 0 : index
    %c0_13 = arith.constant 0 : index
    %12 = vector.load %arg2[%c1, %c0_12, %c0_13] : memref<4x128x128xbf16, #tpu.memory_space<vmem>>, vector<1x128x128xbf16>
    %13 = vector.shape_cast %12 : vector<1x128x128xbf16> to vector<128x128xbf16>
    %cst_14 = arith.constant dense<0.000000e+00> : vector<8x128xf32>
    %14 = tpu.matmul %11, %13, %cst_14 {dimension_numbers = #tpu.dot_dimension_numbers<[1], [0], [0], [1], [0, 0, 1, 1], [], []>} : vector<8x128xbf16>, vector<128x128xbf16>, vector<8x128xf32> -> vector<8x128xf32>
    %15 = math.tanh %14 : vector<8x128xf32>
    %16 = arith.truncf %15 : vector<8x128xf32> to vector<8x128xbf16>
    %c2 = arith.constant 2 : index
    %c0_15 = arith.constant 0 : index
    %c0_16 = arith.constant 0 : index
    %17 = vector.load %arg2[%c2, %c0_15, %c0_16] : memref<4x128x128xbf16, #tpu.memory_space<vmem>>, vector<1x128x128xbf16>
    %18 = vector.shape_cast %17 : vector<1x128x128xbf16> to vector<128x128xbf16>
    %cst_17 = arith.constant dense<0.000000e+00> : vector<8x128xf32>
    %19 = tpu.matmul %16, %18, %cst_17 {dimension_numbers = #tpu.dot_dimension_numbers<[1], [0], [0], [1], [0, 0, 1, 1], [], []>} : vector<8x128xbf16>, vector<128x128xbf16>, vector<8x128xf32> -> vector<8x128xf32>
    %cst_18 = arith.constant 0.000000e+00 : f32
    %20 = vector.broadcast %cst_18 : f32 to vector<8x128xf32>
    %21 = arith.maximumf %19, %20 : vector<8x128xf32>
    %22 = arith.truncf %21 : vector<8x128xf32> to vector<8x128xbf16>
    %c3 = arith.constant 3 : index
    %c0_19 = arith.constant 0 : index
    %c0_20 = arith.constant 0 : index
    %23 = vector.load %arg2[%c3, %c0_19, %c0_20] : memref<4x128x128xbf16, #tpu.memory_space<vmem>>, vector<1x128x128xbf16>
    %24 = vector.shape_cast %23 : vector<1x128x128xbf16> to vector<128x128xbf16>
    %cst_21 = arith.constant dense<0.000000e+00> : vector<8x128xf32>
    %25 = tpu.matmul %22, %24, %cst_21 {dimension_numbers = #tpu.dot_dimension_numbers<[1], [0], [0], [1], [0, 0, 1, 1], [], []>} : vector<8x128xbf16>, vector<128x128xbf16>, vector<8x128xf32> -> vector<8x128xf32>
    %c0_22 = arith.constant 0 : index
    %c0_23 = arith.constant 0 : index
    %26 = vector.load %arg3[%c0_22, %c0_23] : memref<8x128xf32, #tpu.memory_space<vmem>>, vector<8x128xf32>
    tpu.vector_store %arg3[%c0_22, %c0_23], %25 {strides = array<i32>} : memref<8x128xf32, #tpu.memory_space<vmem>>, vector<8x128xf32>,
    return
  }
  func.func @transform_0(%arg0: i32) -> (i32, i32, i32) {
    %c7_i32 = arith.constant 7 : i32
    %c0_i32 = arith.constant 0 : i32
    %c0_i32_0 = arith.constant 0 : i32
    %c0_i32_1 = arith.constant 0 : i32
    return %c7_i32, %c0_i32, %c0_i32_0 : i32, i32, i32
  }
  func.func @transform_1(%arg0: i32) -> (i32, i32, i32) {
    %c0_i32 = arith.constant 0 : i32
    %c0_i32_0 = arith.constant 0 : i32
    %c0_i32_1 = arith.constant 0 : i32
    %c0_i32_2 = arith.constant 0 : i32
    return %c0_i32, %c0_i32_0, %c0_i32_1 : i32, i32, i32
  }
  func.func @transform_2(%arg0: i32) -> (i32, i32) {
    %c0_i32 = arith.constant 0 : i32
    %c0_i32_0 = arith.constant 0 : i32
    %c0_i32_1 = arith.constant 0 : i32
    return %c0_i32, %c0_i32_0 : i32, i32
  }
}

</mosaic_0001>

<bundles_post_ra>
// kernel: _lambda_.1
= control target key start
LH: loop header
LB: loop body
LE: loop exit
PB: predicated region body
PF: predicated region fallthrough
CT: control target
= control target key end

     0   :  { %7 = vsyncpa [#allocation4], 0  ;;  %s622_s0 = inlined_call_operand.hbm [shape: f32[8,2,32], index: 0, kind: input, shape index: {}]   ;;  %s623_s1 = inlined_call_operand.hbm [shape: bf16[4,128,128], index: 1, kind: input, shape index: {}]   ;;  %s624_s2 = inlined_call_operand.vmem [shape: f32[8,128], index: 2, kind: output, shape index: {}]  }
   0x1   :  { %s13_s11 = scalar_lea.hbm %s622_s0, 14 }
   0x2   :  { %8 = vsyncpa [#allocation6], 0  ;;  %s15_s12 = sshll.u32 %s13_s11, 4  ;;  %s593_s13 = smov [#allocation3]   ;;  %s16_s12 = int_to_ptr.hbm [resolvable:$true] %s15_s12 }
   0x3   :  { %s17_s14 = sshll.u32 %s593_s13, 4  ;;  %s25_s17 = sshll.u32 %s623_s1, 4  ;;  %s18_s14 = int_to_ptr.vmem [resolvable:$true] %s17_s14  ;;  %s26_s17 = int_to_ptr.hbm [resolvable:$true] %s25_s17 }
   0x4   :  { %20 = dma.hbm_to_vmem [thread:$0]  %s16_s12, 32, %s18_s14, [#allocation4]  }
   0x5   :  { %s594_s18 = smov [#allocation5]   ;;  %s595_s20 = smov 64  }
   0x6   :  { %s27_s19 = sshll.u32 %s594_s18, 4  ;;  %s596_s21 = smov 4   ;;  %s28_s19 = int_to_ptr.vmem [resolvable:$true] %s27_s19 }
   0x7   :  { %33 = dma.hbm_to_vmem [thread:$0]  %s26_s17, 4096, %s28_s19, [#allocation6], %s595_s20, %s595_s20, %s596_s21  }
   0x8   :  { %589 = dma.done.wait [#allocation4], 32  }
   0x9   :  { %590 = vsyncadd [#allocation4], 4294967264 }
   0xa   :  { %591 = dma.done.wait [#allocation6], 4096  }
   0xb   :  { %592 = vsyncadd [#allocation6], 4294963200  ;;  %v597_v0 = vmov 0.0   ;;  %v507_v1 = vld [vmem:[#allocation5 + $0x38] sm:$0xff]  ;;  %vm44_vm0 = vcmask 254976   ;;  %v506_v2 = vld [vmem:[#allocation5 + $0x30] sm:$0xff] }
   0xc   :  { %42 = vst [vmem:[#allocation2] sm:$0xff] %v597_v0  ;;  %112 = vmatpush.bf16.msra.mxu0 %v507_v1  ;;  %v43_v3 = vld [vmem:[#allocation3] sm:$0x3]  ;;  %v514_v5 = vld [vmem:[#allocation5 + $0x70] sm:$0xff]  ;;  %v505_v6 = vld [vmem:[#allocation5 + $0x28] sm:$0xff] }
   0xd   :  { %45 = vst.msk [vmem:[#allocation2] sm:$0x3] %vm44_vm0, %v43_v3  ;;  %v515_v4 = vld [vmem:[#allocation5 + $0x78] sm:$0xff]  ;;  %v513_v7 = vld [vmem:[#allocation5 + $0x68] sm:$0xff]  ;;  %v504_v8 = vld [vmem:[#allocation5 + $0x20] sm:$0xff] }
   0xe   :  { %192 = vmatpush.bf16.msra.mxu1 %v515_v4  ;;  %v512_v9 = vld [vmem:[#allocation5 + $0x60] sm:$0xff]  ;;  %v503_v10 = vld [vmem:[#allocation5 + $0x18] sm:$0xff]  ;;  %v502_v12 = vld [vmem:[#allocation5 + $0x10] sm:$0xff] }
   0xf   :  { %v511_v11 = vld [vmem:[#allocation5 + $0x58] sm:$0xff]  ;;  %v510_v13 = vld [vmem:[#allocation5 + $0x50] sm:$0xff]  ;;  %v501_v14 = vld [vmem:[#allocation5 + $0x8] sm:$0xff] }
  0x10   :  { %113 = vmatpush.bf16.msra.mxu0 %v506_v2  ;;  %v500_v15 = vld [vmem:[#allocation5] sm:$0xff]  ;;  %v509_v18 = vld [vmem:[#allocation5 + $0x48] sm:$0xff]  ;;  %v523_v20 = vld [vmem:[#allocation5 + $0xb8] sm:$0xff] }
  0x11   :  { %v508_v19 = vld [vmem:[#allocation5 + $0x40] sm:$0xff]  ;;  %272 = vmatpush.bf16.msra.mxu2 %v523_v20  ;;  %v522_v21 = vld [vmem:[#allocation5 + $0xb0] sm:$0xff]  ;;  %v521_v22 = vld [vmem:[#allocation5 + $0xa8] sm:$0xff] }
  0x12   :  { %193 = vmatpush.bf16.msra.mxu1 %v514_v5  ;;  %v520_v23 = vld [vmem:[#allocation5 + $0xa0] sm:$0xff]  ;;  %v519_v24 = vld [vmem:[#allocation5 + $0x98] sm:$0xff]  ;;  %v518_v25 = vld [vmem:[#allocation5 + $0x90] sm:$0xff] }
  0x13   :  { %v517_v30 = vld [vmem:[#allocation5 + $0x88] sm:$0xff]  ;;  %v516_v31 = vld [vmem:[#allocation5 + $0x80] sm:$0xff]  ;;  %v531_v32 = vld [vmem:[#allocation5 + $0xf8] sm:$0xff] }
  0x14   :  { %114 = vmatpush.bf16.msra.mxu0 %v505_v6  ;;  %v46_v16 = vld [vmem:[#allocation2] sm:$0xff]  ;;  %352 = vmatpush.bf16.msra.mxu3 %v531_v32  ;;  %v529_v34 = vld [vmem:[#allocation5 + $0xe8] sm:$0xff]  ;;  %v528_v35 = vld [vmem:[#allocation5 + $0xe0] sm:$0xff] }
  0x15   :  { %v47_v17 = vpack.c.bf16 %v46_v16, %v46_v16  ;;  %273 = vmatpush.bf16.msra.mxu2 %v522_v21  ;;  %v530_v33 = vld [vmem:[#allocation5 + $0xf0] sm:$0xff]  ;;  %v527_v36 = vld [vmem:[#allocation5 + $0xd8] sm:$0xff]  ;;  %v525_v39 = vld [vmem:[#allocation5 + $0xc8] sm:$0xff] }
  0x16   :  { %194 = vmatpush.bf16.msra.mxu1 %v513_v7  ;;  %v526_v37 = vld [vmem:[#allocation5 + $0xd0] sm:$0xff]  ;;  %v524_v43 = vld [vmem:[#allocation5 + $0xc0] sm:$0xff] }
  0x18   :  { %115 = vmatpush.bf16.msra.mxu0 %v504_v8  ;;  %353 = vmatpush.bf16.msra.mxu3 %v530_v33 }
  0x19   :  { %274 = vmatpush.bf16.msra.mxu2 %v521_v22 }
  0x1a   :  { %195 = vmatpush.bf16.msra.mxu1 %v512_v9 }
  0x1c   :  { %116 = vmatpush.bf16.msra.mxu0 %v503_v10  ;;  %354 = vmatpush.bf16.msra.mxu3 %v529_v34 }
  0x1d   :  { %275 = vmatpush.bf16.msra.mxu2 %v520_v23 }
  0x1e   :  { %196 = vmatpush.bf16.msra.mxu1 %v511_v11 }
  0x20   :  { %117 = vmatpush.bf16.msra.mxu0 %v502_v12  ;;  %355 = vmatpush.bf16.msra.mxu3 %v528_v35 }
  0x21   :  { %276 = vmatpush.bf16.msra.mxu2 %v519_v24 }
  0x22   :  { %197 = vmatpush.bf16.msra.mxu1 %v510_v13 }
  0x24   :  { %118 = vmatpush.bf16.msra.mxu0 %v501_v14  ;;  %356 = vmatpush.bf16.msra.mxu3 %v527_v36 }
  0x25   :  { %277 = vmatpush.bf16.msra.mxu2 %v518_v25 }
  0x26   :  { %198 = vmatpush.bf16.msra.mxu1 %v509_v18 }
  0x28   :  { %119 = vmatpush.bf16.msra.mxu0 %v500_v15  ;;  %357 = vmatpush.bf16.msra.mxu3 %v526_v37 }
  0x29   :  { %278 = vmatpush.bf16.msra.mxu2 %v517_v30 }
  0x2a   :  { %199 = vmatpush.bf16.msra.mxu1 %v508_v19 }
  0x2b   :  { %120 = vmatmul.bf16.vlgmr.msra.gmra.mxu0 %v47_v17 }
  0x2c   :  { %358 = vmatpush.bf16.msra.mxu3 %v525_v39 }
  0x2d   :  { %279 = vmatpush.bf16.msra.mxu2 %v516_v31 }
  0x30   :  { %359 = vmatpush.bf16.msra.mxu3 %v524_v43 }
  0xa8   :  { %v121_v26 = vpop.f32.mrf.mxu0 }
  0xa9   :  { %537 = vtanh.f32 %v121_v26 }
  0xaf   :  { %v538_v27 = vpop.eup %537 }
  0xb0   :  { %v123_v28 = vpop.f32.mrf.mxu0  ;;  %v126_v29 = vpack.c.bf16 %v538_v27, %v538_v27 }
  0xb2   :  { %200 = vmatmul.bf16.vlgmr.msra.gmra.mxu1 %v126_v29 }
 0x12f   :  { %v201_v38 = vpop.f32.mrf.mxu1 }
 0x130   :  { %539 = vtanh.f32 %v201_v38 }
 0x136   :  { %v540_v40 = vpop.eup %539 }
 0x137   :  { %v203_v41 = vpop.f32.mrf.mxu1  ;;  %v206_v42 = vpack.c.bf16 %v540_v40, %v540_v40 }
 0x139   :  { %280 = vmatmul.bf16.vlgmr.msra.gmra.mxu2 %v206_v42 }
 0x1bc   :  { %v281_v44 = vpop.f32.mrf.mxu2 }
 0x1bd   :  { %v285_v45 = vmax.f32 %v281_v44, 0.0 }
 0x1bf   :  { %v286_v46 = vpack.c.bf16 %v285_v45, %v285_v45 }
 0x1c1   :  { %360 = vmatmul.bf16.vlgmr.msra.gmra.mxu3 %v286_v46 }
 0x1c4   :  { %v283_v47 = vpop.f32.mrf.mxu2 }
 0x244   :  { %v361_v48 = vpop.f32.mrf.mxu3 }
 0x245   :  { %365 = vst [vmem:[%s624_s2] sm:$0xff] %v361_v48 }
 0x24c   :  { %v363_v49 = vpop.f32.mrf.mxu3 }
 0x24d   :  { %370 = vsyncpa [#allocation4], 1 }
 0x24e   :  { %371 = vsyncpa [#allocation6], 1 }

</bundles_post_ra>
